<compile_context>
chip_gen: v6e
topology: v6e:2x2x1
jax: 0.10.0
libtpu: 0.0.40
codegen_flags: <defaults>
</compile_context>

<pallas_src>
import functools

import numpy as np
import jax
import jax.numpy as jnp
from jax.experimental import pallas as pl
from jax.experimental.pallas import tpu as pltpu


LANE, SUB = 128, 8


# ----------------------------- helpers -----------------------------

def _round_up(x, m):
    return ((x + m - 1) // m) * m


def _cdiv(a, b):
    return (a + b - 1) // b


def _chip_kind():
    try:
        return jax.devices()[0].device_kind.lower()
    except Exception:
        return ""


def _vmem_capacity_bytes():
    try:
        return int(pltpu.get_tpu_info().vmem_capacity_bytes)
    except Exception:
        return 64 << 20  # conservative: v7x per-TC VMEM


def _pick_batch_tile(b_sub, kind):
    """Batch tile: fill the MXU, keep >=2 grid steps on dual-TC chips, divide b_sub."""
    is_v5e = ("v5e" in kind) or ("v5" in kind and "lite" in kind)
    target = 128 if is_v5e else 256          # v5e MXU is 128 wide; v6e/v7x are 256 wide
    min_grid = 2 if "v7" in kind else 1      # v7x: 2 TensorCores share the 'parallel' axis
    if min_grid > 1 and b_sub >= 2 * SUB:
        target = min(target, _round_up(_cdiv(b_sub, min_grid), SUB))
    tb = min(_round_up(target, SUB), b_sub)
    while b_sub % tb:                        # make tb divide b_sub -> all blocks full/dense
        tb -= SUB
    return max(tb, SUB)


# ----------------------------- Pallas kernel -----------------------------

def _mlp_trunk_kernel(*refs, num_layers):
    """Fused cast + flattened MLP (Linear + ReLU per layer) over one batch tile."""
    x_ref = refs[0]
    w_refs = refs[1:1 + num_layers]
    b_refs = refs[1 + num_layers:1 + 2 * num_layers]
    o_ref = refs[1 + 2 * num_layers]

    # Lambda(lambda x: x.float()) fused here: free VPU cast on the resident VMEM tile.
    h = x_ref[...].astype(jnp.float32)
    for l in range(num_layers):
        w = w_refs[l][...]
        lhs = h if w.dtype == jnp.float32 else h.astype(w.dtype)   # bf16-weight option
        h = jnp.dot(lhs, w, preferred_element_type=jnp.float32)
        h = jnp.maximum(h + b_refs[l][...], 0.0)                   # ReLU
    o_ref[...] = h.astype(o_ref.dtype)


# ----------------------------- param preparation (hoisted, one-time) -----------------------------

def prepare_mlp_trunk_params(params, in_dim, weights_dtype=jnp.float32):
    """Pad to lane multiples and cast weights/biases ONCE, outside the forward path.

    weights_dtype=jnp.bfloat16 halves weight HBM traffic and VMEM residency (recommended
    for v5e, and for large trunks on v7x's 64 MiB VMEM) at the cost of looser tolerance.
    Zero padding keeps results exact: padded K rows only ever multiply padded-zero
    activations, and padded N columns stay exactly 0 through bias + ReLU.
    """
    k0 = _round_up(int(in_dim), LANE)
    n_pads = [_round_up(int(w.shape[1]), LANE) for (w, _) in params]
    k_pads = [k0] + n_pads[:-1]
    ws, bs = [], []
    for (w, b), kp, npad in zip(params, k_pads, n_pads):
        k, n = int(w.shape[0]), int(w.shape[1])
        ws.append(jnp.pad(w.astype(weights_dtype), ((0, kp - k), (0, npad - n))))
        bs.append(jnp.pad(b.astype(jnp.float32).reshape(1, n), ((0, 0), (0, npad - n))))
    return {
        "ws": ws, "bs": bs,
        "in_dim": int(in_dim), "k0": k0, "k_pads": k_pads, "n_pads": n_pads,
        "n_last": int(params[-1][0].shape[1]),
    }


# ----------------------------- forward wrapper -----------------------------

def mlp_trunk_forward(x, prepared, out_dtype=jnp.float32):
    """x: (B, *input_shape) any dtype -> (B, hidden_sizes[-1]) out_dtype."""
    B = x.shape[0]
    x_flat = x.reshape(B, -1)                                      # BatchFlatten
    in_dim, k0 = prepared["in_dim"], prepared["k0"]
    assert x_flat.shape[1] == in_dim
    k_pads, n_pads = prepared["k_pads"], prepared["n_pads"]
    ws, bs = prepared["ws"], prepared["bs"]
    num_layers = len(ws)
    n_last, n_last_pad = prepared["n_last"], n_pads[-1]

    kind = _chip_kind()
    b_sub = _round_up(B, SUB)
    tb = _pick_batch_tile(b_sub, kind)
    grid = (b_sub // tb,)

    # Pad the observation only when strictly necessary (no-op for lane-aligned obs dims
    # and sublane-aligned batch sizes — the common RL case).
    if b_sub != B or k0 != in_dim:
        x_in = jnp.pad(x_flat, ((0, b_sub - B), (0, k0 - in_dim)))
    else:
        x_in = x_flat

    # --- VMEM budget from actual buffer counts -------------------------------------
    wd = jnp.dtype(ws[0].dtype).itemsize
    weight_bytes = sum(kp * npad * wd for kp, npad in zip(k_pads, n_pads))    # 1x (Buffered(1))
    bias_bytes = sum(npad * 4 for npad in n_pads)                             # 1x
    io_bytes = (2 * tb * k0 * x_in.dtype.itemsize
                + 2 * tb * n_last_pad * jnp.dtype(out_dtype).itemsize)        # double-buffered
    act_bytes = 2 * tb * max([k0] + n_pads) * 4                               # live intermediates / spill
    vmem_needed = weight_bytes + bias_bytes + io_bytes + act_bytes + (1 << 20)
    vmem_cap = _vmem_capacity_bytes()
    if vmem_needed > int(0.9 * vmem_cap):
        # TODO(synk): for trunks whose resident weights exceed VMEM, add a K/N-tiled
        # reduction grid (stream weights, f32 accumulator scratch + pl.when init/finalize)
        # instead of this fully-fused resident-weight path.
        raise NotImplementedError(
            f"MLPTrunk VMEM need ({vmem_needed / 2**20:.1f} MiB) exceeds budget "
            f"({vmem_cap / 2**20:.0f} MiB); tiled-weight path not implemented.")
    vmem_limit = int(min(max(2 * vmem_needed, 32 << 20), 0.9 * vmem_cap))
    # NOTE: if tb is raised to 256-512 with very wide hidden layers, consider bounding
    # CompilerParams(internal_scratch_in_bytes=...) for the spilled intermediate h.

    def call(single_buffer_weights):
        # Grid-invariant blocks (constant index_map) don't need double buffers.
        resident = dict(pipeline_mode=pl.Buffered(1)) if single_buffer_weights else {}
        in_specs = [pl.BlockSpec((tb, k0), lambda i: (i, 0))]                 # batch tile of x
        for kp, npad in zip(k_pads, n_pads):                                  # full weights, resident
            in_specs.append(pl.BlockSpec((kp, npad), lambda i: (0, 0), **resident))
        for npad in n_pads:                                                   # full biases, resident
            in_specs.append(pl.BlockSpec((1, npad), lambda i: (0, 0), **resident))
        out_spec = pl.BlockSpec((tb, n_last_pad), lambda i: (i, 0))
        return pl.pallas_call(
            functools.partial(_mlp_trunk_kernel, num_layers=num_layers),
            out_shape=jax.ShapeDtypeStruct((b_sub, n_last_pad), out_dtype),
            grid_spec=pltpu.PrefetchScalarGridSpec(
                num_scalar_prefetch=0,
                grid=grid,
                in_specs=in_specs,
                out_specs=out_spec,
            ),
            compiler_params=pltpu.CompilerParams(
                dimension_semantics=("parallel",),
                vmem_limit_bytes=vmem_limit,
            ),
        )(x_in, *ws, *bs)

    try:
        out_padded = call(single_buffer_weights=True)
    except Exception:
        # Fallback if this jax build rejects Buffered(1) on grid-invariant blocks.
        out_padded = call(single_buffer_weights=False)

    return out_padded[:B, :n_last]


# ----------------------------- params -----------------------------

def init_mlp_trunk_params(input_shape, hidden_sizes, key):
    """Deterministic synthetic init (roughly Kaiming-uniform scale like nn.Linear)."""
    in_dim = int(np.prod(input_shape))
    params = []
    dims = [in_dim] + list(hidden_sizes)
    for din, dout in zip(dims[:-1], dims[1:]):
        kw, kb, key = jax.random.split(key, 3)
        bound = 1.0 / np.sqrt(din)
        w = jax.random.uniform(kw, (din, dout), jnp.float32, -bound, bound)
        b = jax.random.uniform(kb, (1, dout), jnp.float32, -bound, bound)
        params.append((w, b))
    return params


# ----------------------------- demo / check -----------------------------

if __name__ == "__main__":
    key = jax.random.PRNGKey(0)
    kx, kp = jax.random.split(key)

    input_shape = (4, 16, 16)          # (C, H, W), NCHW convention
    hidden_sizes = [64, 32]
    batch = 2

    # Integer "observation"-style input to exercise the fused .float() cast.
    x = jax.random.randint(kx, (batch,) + input_shape, 0, 256, dtype=jnp.int32)

    params = init_mlp_trunk_params(input_shape, hidden_sizes, kp)
    prepared = prepare_mlp_trunk_params(params, int(np.prod(input_shape)))   # one-time pad/cast

    out = mlp_trunk_forward(x, prepared)
    out = jax.block_until_ready(out)

    # Pure-JAX reference (the spec's forward pass).
    h_ref = x.astype(jnp.float32).reshape(batch, -1)
    for (w, b) in params:
        h_ref = jnp.maximum(h_ref @ w + b, 0.0)
    assert out.shape == (batch, hidden_sizes[-1])
    np.testing.assert_allclose(np.asarray(out), np.asarray(h_ref), rtol=1e-5, atol=1e-4)

    print("KERNEL_OK")
</pallas_src>

<mosaic_0001>
module attributes {stable_mosaic.version = 11 : i64} {
  func.func @_mlp_trunk_kernel(%arg0: i32, %arg1: memref<8x1024xi32, #tpu.memory_space<vmem>>, %arg2: memref<1024x128xf32, #tpu.memory_space<vmem>>, %arg3: memref<128x128xf32, #tpu.memory_space<vmem>>, %arg4: memref<1x128xf32, #tpu.memory_space<vmem>>, %arg5: memref<1x128xf32, #tpu.memory_space<vmem>>, %arg6: memref<8x128xf32, #tpu.memory_space<vmem>>) attributes {dimension_semantics = [#tpu.dimension_semantics<parallel>], iteration_bounds = array<i64: 1>, scalar_prefetch = 0 : i64, scratch_operands = 0 : i64, tpu.core_type = #tpu.core_type<tc>, window_params = [{transform_indices = @transform_0, window_bounds = array<i64: 8, 1024>}, {pipeline_mode = #tpu.pipeline_mode<synchronous>, transform_indices = @transform_1, window_bounds = array<i64: 1024, 128>}, {pipeline_mode = #tpu.pipeline_mode<synchronous>, transform_indices = @transform_2, window_bounds = array<i64: 128, 128>}, {pipeline_mode = #tpu.pipeline_mode<synchronous>, transform_indices = @transform_3, window_bounds = array<i64: 1, 128>}, {pipeline_mode = #tpu.pipeline_mode<synchronous>, transform_indices = @transform_4, window_bounds = array<i64: 1, 128>}, {transform_indices = @transform_5, window_bounds = array<i64: 8, 128>}]} {
    %c0 = arith.constant 0 : index
    %c0_0 = arith.constant 0 : index
    %0 = vector.load %arg1[%c0, %c0_0] : memref<8x1024xi32, #tpu.memory_space<vmem>>, vector<8x1024xi32>
    %1 = arith.sitofp %0 : vector<8x1024xi32> to vector<8x1024xf32>
    %c0_1 = arith.constant 0 : index
    %c0_2 = arith.constant 0 : index
    %2 = vector.load %arg2[%c0_1, %c0_2] : memref<1024x128xf32, #tpu.memory_space<vmem>>, vector<1024x128xf32>
    %cst = arith.constant dense<0.000000e+00> : vector<8x128xf32>
    %3 = tpu.matmul %1, %2, %cst {dimension_numbers = #tpu.dot_dimension_numbers<[1], [0], [0], [1], [0, 0, 1, 1], [], []>} : vector<8x1024xf32>, vector<1024x128xf32>, vector<8x128xf32> -> vector<8x128xf32>
    %c0_3 = arith.constant 0 : index
    %c0_4 = arith.constant 0 : index
    %4 = vector.load %arg4[%c0_3, %c0_4] : memref<1x128xf32, #tpu.memory_space<vmem>>, vector<1x128xf32>
    %5 = vector.broadcast %4 : vector<1x128xf32> to vector<8x128xf32>
    %6 = arith.addf %3, %5 : vector<8x128xf32>
    %cst_5 = arith.constant 0.000000e+00 : f32
    %7 = vector.broadcast %cst_5 : f32 to vector<8x128xf32>
    %8 = arith.maximumf %6, %7 : vector<8x128xf32>
    %c0_6 = arith.constant 0 : index
    %c0_7 = arith.constant 0 : index
    %9 = vector.load %arg3[%c0_6, %c0_7] : memref<128x128xf32, #tpu.memory_space<vmem>>, vector<128x128xf32>
    %cst_8 = arith.constant dense<0.000000e+00> : vector<8x128xf32>
    %10 = tpu.matmul %8, %9, %cst_8 {dimension_numbers = #tpu.dot_dimension_numbers<[1], [0], [0], [1], [0, 0, 1, 1], [], []>} : vector<8x128xf32>, vector<128x128xf32>, vector<8x128xf32> -> vector<8x128xf32>
    %c0_9 = arith.constant 0 : index
    %c0_10 = arith.constant 0 : index
    %11 = vector.load %arg5[%c0_9, %c0_10] : memref<1x128xf32, #tpu.memory_space<vmem>>, vector<1x128xf32>
    %12 = vector.broadcast %11 : vector<1x128xf32> to vector<8x128xf32>
    %13 = arith.addf %10, %12 : vector<8x128xf32>
    %cst_11 = arith.constant 0.000000e+00 : f32
    %14 = vector.broadcast %cst_11 : f32 to vector<8x128xf32>
    %15 = arith.maximumf %13, %14 : vector<8x128xf32>
    %c0_12 = arith.constant 0 : index
    %c0_13 = arith.constant 0 : index
    %16 = vector.load %arg6[%c0_12, %c0_13] : memref<8x128xf32, #tpu.memory_space<vmem>>, vector<8x128xf32>
    tpu.vector_store %arg6[%c0_12, %c0_13], %15 {strides = array<i32>} : memref<8x128xf32, #tpu.memory_space<vmem>>, vector<8x128xf32>,
    return
  }
  func.func @transform_0(%arg0: i32) -> (i32, i32) {
    %c0_i32 = arith.constant 0 : i32
    %c0_i32_0 = arith.constant 0 : i32
    return %arg0, %c0_i32 : i32, i32
  }
  func.func @transform_1(%arg0: i32) -> (i32, i32) {
    %c0_i32 = arith.constant 0 : i32
    %c0_i32_0 = arith.constant 0 : i32
    %c0_i32_1 = arith.constant 0 : i32
    return %c0_i32, %c0_i32_0 : i32, i32
  }
  func.func @transform_2(%arg0: i32) -> (i32, i32) {
    %c0_i32 = arith.constant 0 : i32
    %c0_i32_0 = arith.constant 0 : i32
    %c0_i32_1 = arith.constant 0 : i32
    return %c0_i32, %c0_i32_0 : i32, i32
  }
  func.func @transform_3(%arg0: i32) -> (i32, i32) {
    %c0_i32 = arith.constant 0 : i32
    %c0_i32_0 = arith.constant 0 : i32
    %c0_i32_1 = arith.constant 0 : i32
    return %c0_i32, %c0_i32_0 : i32, i32
  }
  func.func @transform_4(%arg0: i32) -> (i32, i32) {
    %c0_i32 = arith.constant 0 : i32
    %c0_i32_0 = arith.constant 0 : i32
    %c0_i32_1 = arith.constant 0 : i32
    return %c0_i32, %c0_i32_0 : i32, i32
  }
  func.func @transform_5(%arg0: i32) -> (i32, i32) {
    %c0_i32 = arith.constant 0 : i32
    %c0_i32_0 = arith.constant 0 : i32
    return %arg0, %c0_i32 : i32, i32
  }
}

module attributes {stable_mosaic.version = 11 : i64} {
  func.func @_mlp_trunk_kernel(%arg0: i32, %arg1: memref<8x1024xi32, #tpu.memory_space<vmem>>, %arg2: memref<1024x128xf32, #tpu.memory_space<vmem>>, %arg3: memref<128x128xf32, #tpu.memory_space<vmem>>, %arg4: memref<1x128xf32, #tpu.memory_space<vmem>>, %arg5: memref<1x128xf32, #tpu.memory_space<vmem>>, %arg6: memref<8x128xf32, #tpu.memory_space<vmem>>) attributes {dimension_semantics = [#tpu.dimension_semantics<parallel>], iteration_bounds = array<i64: 1>, scalar_prefetch = 0 : i64, scratch_operands = 0 : i64, tpu.core_type = #tpu.core_type<tc>, window_params = [{transform_indices = @transform_0, window_bounds = array<i64: 8, 1024>}, {pipeline_mode = #tpu.pipeline_mode<synchronous>, transform_indices = @transform_1, window_bounds = array<i64: 1024, 128>}, {pipeline_mode = #tpu.pipeline_mode<synchronous>, transform_indices = @transform_2, window_bounds = array<i64: 128, 128>}, {pipeline_mode = #tpu.pipeline_mode<synchronous>, transform_indices = @transform_3, window_bounds = array<i64: 1, 128>}, {pipeline_mode = #tpu.pipeline_mode<synchronous>, transform_indices = @transform_4, window_bounds = array<i64: 1, 128>}, {transform_indices = @transform_5, window_bounds = array<i64: 8, 128>}]} {
    %c0 = arith.constant 0 : index
    %c0_0 = arith.constant 0 : index
    %0 = vector.load %arg1[%c0, %c0_0] : memref<8x1024xi32, #tpu.memory_space<vmem>>, vector<8x1024xi32>
    %1 = arith.sitofp %0 : vector<8x1024xi32> to vector<8x1024xf32>
    %c0_1 = arith.constant 0 : index
    %c0_2 = arith.constant 0 : index
    %2 = vector.load %arg2[%c0_1, %c0_2] : memref<1024x128xf32, #tpu.memory_space<vmem>>, vector<1024x128xf32>
    %cst = arith.constant dense<0.000000e+00> : vector<8x128xf32>
    %3 = tpu.matmul %1, %2, %cst {dimension_numbers = #tpu.dot_dimension_numbers<[1], [0], [0], [1], [0, 0, 1, 1], [], []>} : vector<8x1024xf32>, vector<1024x128xf32>, vector<8x128xf32> -> vector<8x128xf32>
    %c0_3 = arith.constant 0 : index
    %c0_4 = arith.constant 0 : index
    %4 = vector.load %arg4[%c0_3, %c0_4] : memref<1x128xf32, #tpu.memory_space<vmem>>, vector<1x128xf32>
    %5 = vector.broadcast %4 : vector<1x128xf32> to vector<8x128xf32>
    %6 = arith.addf %3, %5 : vector<8x128xf32>
    %cst_5 = arith.constant 0.000000e+00 : f32
    %7 = vector.broadcast %cst_5 : f32 to vector<8x128xf32>
    %8 = arith.maximumf %6, %7 : vector<8x128xf32>
    %c0_6 = arith.constant 0 : index
    %c0_7 = arith.constant 0 : index
    %9 = vector.load %arg3[%c0_6, %c0_7] : memref<128x128xf32, #tpu.memory_space<vmem>>, vector<128x128xf32>
    %cst_8 = arith.constant dense<0.000000e+00> : vector<8x128xf32>
    %10 = tpu.matmul %8, %9, %cst_8 {dimension_numbers = #tpu.dot_dimension_numbers<[1], [0], [0], [1], [0, 0, 1, 1], [], []>} : vector<8x128xf32>, vector<128x128xf32>, vector<8x128xf32> -> vector<8x128xf32>
    %c0_9 = arith.constant 0 : index
    %c0_10 = arith.constant 0 : index
    %11 = vector.load %arg5[%c0_9, %c0_10] : memref<1x128xf32, #tpu.memory_space<vmem>>, vector<1x128xf32>
    %12 = vector.broadcast %11 : vector<1x128xf32> to vector<8x128xf32>
    %13 = arith.addf %10, %12 : vector<8x128xf32>
    %cst_11 = arith.constant 0.000000e+00 : f32
    %14 = vector.broadcast %cst_11 : f32 to vector<8x128xf32>
    %15 = arith.maximumf %13, %14 : vector<8x128xf32>
    %c0_12 = arith.constant 0 : index
    %c0_13 = arith.constant 0 : index
    %16 = vector.load %arg6[%c0_12, %c0_13] : memref<8x128xf32, #tpu.memory_space<vmem>>, vector<8x128xf32>
    tpu.vector_store %arg6[%c0_12, %c0_13], %15 {strides = array<i32>} : memref<8x128xf32, #tpu.memory_space<vmem>>, vector<8x128xf32>,
    return
  }
  func.func @transform_0(%arg0: i32) -> (i32, i32) {
    %c0_i32 = arith.constant 0 : i32
    %c0_i32_0 = arith.constant 0 : i32
    return %arg0, %c0_i32 : i32, i32
  }
  func.func @transform_1(%arg0: i32) -> (i32, i32) {
    %c0_i32 = arith.constant 0 : i32
    %c0_i32_0 = arith.constant 0 : i32
    %c0_i32_1 = arith.constant 0 : i32
    return %c0_i32, %c0_i32_0 : i32, i32
  }
  func.func @transform_2(%arg0: i32) -> (i32, i32) {
    %c0_i32 = arith.constant 0 : i32
    %c0_i32_0 = arith.constant 0 : i32
    %c0_i32_1 = arith.constant 0 : i32
    return %c0_i32, %c0_i32_0 : i32, i32
  }
  func.func @transform_3(%arg0: i32) -> (i32, i32) {
    %c0_i32 = arith.constant 0 : i32
    %c0_i32_0 = arith.constant 0 : i32
    %c0_i32_1 = arith.constant 0 : i32
    return %c0_i32, %c0_i32_0 : i32, i32
  }
  func.func @transform_4(%arg0: i32) -> (i32, i32) {
    %c0_i32 = arith.constant 0 : i32
    %c0_i32_0 = arith.constant 0 : i32
    %c0_i32_1 = arith.constant 0 : i32
    return %c0_i32, %c0_i32_0 : i32, i32
  }
  func.func @transform_5(%arg0: i32) -> (i32, i32) {
    %c0_i32 = arith.constant 0 : i32
    %c0_i32_0 = arith.constant 0 : i32
    return %arg0, %c0_i32 : i32, i32
  }
}

</mosaic_0001>

<bundles_post_ra>
// kernel: tpu_custom_call.1
= control target key start
LH: loop header
LB: loop body
LE: loop exit
PB: predicated region body
PF: predicated region fallthrough
CT: control target
= control target key end

     0   :  { %10 = vsyncpa [#allocation3], 0  ;;  %s947_s0 = inlined_call_operand.hbm [shape: s32[8,1024], index: 0, kind: input, shape index: {}]   ;;  %s948_s1 = inlined_call_operand.hbm [shape: f32[1024,128], index: 1, kind: input, shape index: {}]   ;;  %s949_s2 = inlined_call_operand.hbm [shape: f32[128,128], index: 2, kind: input, shape index: {}]   ;;  %s950_s3 = inlined_call_operand.vmem [shape: f32[1,128], index: 3, kind: input, shape index: {}]   ;;  %s951_s4 = inlined_call_operand.vmem [shape: f32[1,128], index: 4, kind: input, shape index: {}]   ;;  %s952_s5 = inlined_call_operand.hbm [shape: f32[8,128], index: 5, kind: output, shape index: {}]  }
   0x1   :  { %11 = vsyncpa [#allocation6], 0 }
   0x2   :  { %12 = vsyncpa [#allocation4], 0  ;;  %s891_s18 = smov [#allocation5]  }
   0x3   :  { %s28_s19 = sshll.u32 %s891_s18, 4  ;;  %s29_s19 = int_to_ptr.vmem [resolvable:$true] %s28_s19 }
   0x4   :  { %s813_s20 = scalar_lea.vmem %s29_s19, 16384  ;;  %p818_p1 = scmp.lt.s32.totalorder %s29_s19, %s29_s19 }
   0x5   :  { %p814_p0 = scmp.ne.s32.totalorder %s29_s19, %s813_s20  ;;  %p819_p2 = scmp.lt.s32.totalorder %s813_s20, %s813_s20 }
   0x7   :  { %p820_p3 = por %p819_p2, %p818_p1 }
   0x9   :  { %p821_p4 = pnand %p820_p3, %p814_p0 }
   0xb   :  { %824 = shalt.err (!%p821_p4)
}
   0xc   :  { %s892_s21 = smov 128   ;;  %s893_s22 = smov 8  }
   0xd   :  { %34 = dma.hbm_to_vmem [thread:$0]  %s948_s1, 16384, %s29_s19, [#allocation6], %s892_s21, %s892_s21, %s893_s22  }
   0xe   :  { %s894_s25 = smov [#allocation2]   ;;  %s895_s27 = smov [#allocation7]  }
   0xf   :  { %s19_s26 = sshll.u32 %s894_s25, 4  ;;  %s40_s28 = sshll.u32 %s895_s27, 4  ;;  %s20_s26 = int_to_ptr.vmem [resolvable:$true] %s19_s26  ;;  %s41_s28 = int_to_ptr.vmem [resolvable:$true] %s40_s28 }
  0x10   :  { %s833_s29 = scalar_lea.vmem %s20_s26, 1024  ;;  %p838_p6 = scmp.lt.s32.totalorder %s20_s26, %s20_s26 }
  0x11   :  { %p834_p5 = scmp.ne.s32.totalorder %s20_s26, %s833_s29  ;;  %p839_p7 = scmp.lt.s32.totalorder %s833_s29, %s833_s29 }
  0x13   :  { %p840_p8 = por %p839_p7, %p838_p6 }
  0x15   :  { %p841_p9 = pnand %p840_p8, %p834_p5 }
  0x17   :  { %844 = shalt.err (!%p841_p9)
}
  0x18   :  { %22 = dma.hbm_to_vmem [thread:$0]  %s947_s0, 1024, %s20_s26, [#allocation3]  }
  0x19   :  { %s853_s7 = scalar_lea.vmem %s41_s28, 2048  ;;  %p858_p11 = scmp.lt.s32.totalorder %s41_s28, %s41_s28 }
  0x1a   :  { %p854_p10 = scmp.ne.s32.totalorder %s41_s28, %s853_s7  ;;  %p859_p12 = scmp.lt.s32.totalorder %s853_s7, %s853_s7 }
  0x1c   :  { %p860_p13 = por %p859_p12, %p858_p11 }
  0x1e   :  { %p861_p0 = pnand %p860_p13, %p854_p10 }
  0x20   :  { %864 = shalt.err (!%p861_p0)
}
  0x21   :  { %46 = dma.hbm_to_vmem [thread:$0]  %s949_s2, 2048, %s41_s28, [#allocation6], %s892_s21, %s892_s21, %s893_s22  }
  0x22   :  { %885 = dma.done.wait [#allocation3], 1024  }
  0x23   :  { %886 = vsyncadd [#allocation3], 4294966272 }
  0x24   :  { %887 = dma.done.wait [#allocation6], 18432  }
  0x25   :  { %888 = vsyncadd [#allocation6], 4294948864  ;;  %v107_v0 = vld [vmem:[#allocation5 + $0xf8] sm:$0xff]  ;;  %v106_v4 = vld [vmem:[#allocation5 + $0xf0] sm:$0xff]  ;;  %vm897_vm0 = vmmov 0  }
  0x26   :  { %v139_v1 = vld [vmem:[#allocation5 + $0x1f8] sm:$0xff]  ;;  %605 = vmatprep.subr.mxu0 %v107_v0  ;;  %v138_v5 = vld [vmem:[#allocation5 + $0x1f0] sm:$0xff]  ;;  %v105_v8 = vld [vmem:[#allocation5 + $0xe8] sm:$0xff] }
  0x27   :  { %v91_v2 = vld [vmem:[#allocation5 + $0x78] sm:$0xff]  ;;  %640 = vmatprep.subr.mxu1 %v139_v1  ;;  %v90_v6 = vld [vmem:[#allocation5 + $0x70] sm:$0xff]  ;;  %v137_v9 = vld [vmem:[#allocation5 + $0x1e8] sm:$0xff] }
  0x28   :  { %v123_v3 = vld [vmem:[#allocation5 + $0x178] sm:$0xff]  ;;  %606 = vmatpush3.msra.mxu0 %v91_v2  ;;  %v122_v7 = vld [vmem:[#allocation5 + $0x170] sm:$0xff]  ;;  %v89_v10 = vld [vmem:[#allocation5 + $0x68] sm:$0xff] }
  0x29   :  { %641 = vmatpush3.msra.mxu1 %v123_v3  ;;  %607 = vmatprep.subr.mxu0 %v106_v4  ;;  %v121_v11 = vld [vmem:[#allocation5 + $0x168] sm:$0xff]  ;;  %v104_v12 = vld [vmem:[#allocation5 + $0xe0] sm:$0xff]  ;;  %v103_v16 = vld [vmem:[#allocation5 + $0xd8] sm:$0xff] }
  0x2a   :  { %642 = vmatprep.subr.mxu1 %v138_v5  ;;  %608 = vmatpush3.msra.mxu0 %v90_v6  ;;  %v136_v13 = vld [vmem:[#allocation5 + $0x1e0] sm:$0xff]  ;;  %v135_v17 = vld [vmem:[#allocation5 + $0x1d8] sm:$0xff]  ;;  %v102_v20 = vld [vmem:[#allocation5 + $0xd0] sm:$0xff] }
  0x2b   :  { %643 = vmatpush3.msra.mxu1 %v122_v7  ;;  %609 = vmatprep.subr.mxu0 %v105_v8  ;;  %v88_v14 = vld [vmem:[#allocation5 + $0x60] sm:$0xff]  ;;  %v87_v18 = vld [vmem:[#allocation5 + $0x58] sm:$0xff]  ;;  %v134_v21 = vld [vmem:[#allocation5 + $0x1d0] sm:$0xff] }
  0x2c   :  { %644 = vmatprep.subr.mxu1 %v137_v9  ;;  %v120_v15 = vld [vmem:[#allocation5 + $0x160] sm:$0xff]  ;;  %610 = vmatpush3.msra.mxu0 %v89_v10  ;;  %v119_v19 = vld [vmem:[#allocation5 + $0x158] sm:$0xff]  ;;  %v86_v22 = vld [vmem:[#allocation5 + $0x50] sm:$0xff] }
  0x2d   :  { %645 = vmatpush3.msra.mxu1 %v121_v11  ;;  %611 = vmatprep.subr.mxu0 %v104_v12  ;;  %v118_v23 = vld [vmem:[#allocation5 + $0x150] sm:$0xff]  ;;  %v101_v24 = vld [vmem:[#allocation5 + $0xc8] sm:$0xff]  ;;  %v100_v28 = vld [vmem:[#allocation5 + $0xc0] sm:$0xff] }
  0x2e   :  { %646 = vmatprep.subr.mxu1 %v136_v13  ;;  %612 = vmatpush3.msra.mxu0 %v88_v14  ;;  %v133_v25 = vld [vmem:[#allocation5 + $0x1c8] sm:$0xff]  ;;  %v132_v29 = vld [vmem:[#allocation5 + $0x1c0] sm:$0xff]  ;;  %v99_v32 = vld [vmem:[#allocation5 + $0xb8] sm:$0xff] }
  0x2f   :  { %647 = vmatpush3.msra.mxu1 %v120_v15  ;;  %613 = vmatprep.subr.mxu0 %v103_v16  ;;  %v85_v26 = vld [vmem:[#allocation5 + $0x48] sm:$0xff]  ;;  %v84_v30 = vld [vmem:[#allocation5 + $0x40] sm:$0xff]  ;;  %v131_v33 = vld [vmem:[#allocation5 + $0x1b8] sm:$0xff] }
  0x30   :  { %648 = vmatprep.subr.mxu1 %v135_v17  ;;  %614 = vmatpush3.msra.mxu0 %v87_v18  ;;  %v117_v27 = vld [vmem:[#allocation5 + $0x148] sm:$0xff]  ;;  %v116_v31 = vld [vmem:[#allocation5 + $0x140] sm:$0xff]  ;;  %v83_v34 = vld [vmem:[#allocation5 + $0x38] sm:$0xff] }
  0x31   :  { %649 = vmatpush3.msra.mxu1 %v119_v19  ;;  %615 = vmatprep.subr.mxu0 %v102_v20  ;;  %v115_v35 = vld [vmem:[#allocation5 + $0x138] sm:$0xff]  ;;  %v98_v36 = vld [vmem:[#allocation5 + $0xb0] sm:$0xff]  ;;  %v97_v40 = vld [vmem:[#allocation5 + $0xa8] sm:$0xff] }
  0x32   :  { %650 = vmatprep.subr.mxu1 %v134_v21  ;;  %616 = vmatpush3.msra.mxu0 %v86_v22  ;;  %v130_v37 = vld [vmem:[#allocation5 + $0x1b0] sm:$0xff]  ;;  %v129_v41 = vld [vmem:[#allocation5 + $0x1a8] sm:$0xff]  ;;  %v96_v44 = vld [vmem:[#allocation5 + $0xa0] sm:$0xff] }
  0x33   :  { %651 = vmatpush3.msra.mxu1 %v118_v23  ;;  %617 = vmatprep.subr.mxu0 %v101_v24  ;;  %v82_v38 = vld [vmem:[#allocation5 + $0x30] sm:$0xff]  ;;  %v81_v42 = vld [vmem:[#allocation5 + $0x28] sm:$0xff]  ;;  %v128_v45 = vld [vmem:[#allocation5 + $0x1a0] sm:$0xff] }
  0x34   :  { %652 = vmatprep.subr.mxu1 %v133_v25  ;;  %618 = vmatpush3.msra.mxu0 %v85_v26  ;;  %v114_v39 = vld [vmem:[#allocation5 + $0x130] sm:$0xff]  ;;  %v113_v43 = vld [vmem:[#allocation5 + $0x128] sm:$0xff]  ;;  %v80_v46 = vld [vmem:[#allocation5 + $0x20] sm:$0xff] }
  0x35   :  { %653 = vmatpush3.msra.mxu1 %v117_v27  ;;  %619 = vmatprep.subr.mxu0 %v100_v28  ;;  %v112_v47 = vld [vmem:[#allocation5 + $0x120] sm:$0xff]  ;;  %v95_v48 = vld [vmem:[#allocation5 + $0x98] sm:$0xff]  ;;  %v94_v52 = vld [vmem:[#allocation5 + $0x90] sm:$0xff] }
  0x36   :  { %654 = vmatprep.subr.mxu1 %v132_v29  ;;  %620 = vmatpush3.msra.mxu0 %v84_v30  ;;  %v127_v49 = vld [vmem:[#allocation5 + $0x198] sm:$0xff]  ;;  %v126_v53 = vld [vmem:[#allocation5 + $0x190] sm:$0xff]  ;;  %v61_v56 = vld [vmem:[#allocation2 + $0x8] sm:$0xff] }
  0x37   :  { %655 = vmatpush3.msra.mxu1 %v116_v31  ;;  %621 = vmatprep.subr.mxu0 %v99_v32  ;;  %v79_v50 = vld [vmem:[#allocation5 + $0x18] sm:$0xff]  ;;  %v78_v54 = vld [vmem:[#allocation5 + $0x10] sm:$0xff]  ;;  %v93_v57 = vld [vmem:[#allocation5 + $0x88] sm:$0xff]  ;;  %v69_v1 = vcvt.s32.f32 %v61_v56 }
  0x38   :  { %656 = vmatprep.subr.mxu1 %v131_v33  ;;  %622 = vmatpush3.msra.mxu0 %v83_v34  ;;  %v111_v51 = vld [vmem:[#allocation5 + $0x118] sm:$0xff]  ;;  %v110_v55 = vld [vmem:[#allocation5 + $0x110] sm:$0xff]  ;;  %v125_v58 = vld [vmem:[#allocation5 + $0x188] sm:$0xff] }
  0x39   :  { %657 = vmatpush3.msra.mxu1 %v115_v35  ;;  %623 = vmatprep.subr.mxu0 %v98_v36  ;;  %v60_v59 = vld [vmem:[#allocation2] sm:$0xff]  ;;  %v77_v60 = vld [vmem:[#allocation5 + $0x8] sm:$0xff]  ;;  %v63_v62 = vld [vmem:[#allocation2 + $0x18] sm:$0xff] }
  0x3a   :  { %658 = vmatprep.subr.mxu1 %v130_v37  ;;  %624 = vmatpush3.msra.mxu0 %v82_v38  ;;  %v109_v61 = vld [vmem:[#allocation5 + $0x108] sm:$0xff]  ;;  %v92_v63 = vld [vmem:[#allocation5 + $0x80] sm:$0xff]  ;;  %v62_v2 = vld [vmem:[#allocation2 + $0x10] sm:$0xff]  ;;  %v68_v4 = vcvt.s32.f32 %v60_v59  ;;  %v71_v6 = vcvt.s32.f32 %v63_v62 }
  0x3b   :  { %659 = vmatpush3.msra.mxu1 %v114_v39  ;;  %625 = vmatprep.subr.mxu0 %v97_v40  ;;  %v124_v0 = vld [vmem:[#allocation5 + $0x180] sm:$0xff]  ;;  %v171_v7 = vld [vmem:[#allocation5 + $0x2f8] sm:$0xff]  ;;  %v70_v8 = vcvt.s32.f32 %v62_v2  ;;  %v170_v12 = vld [vmem:[#allocation5 + $0x2f0] sm:$0xff] }
  0x3c   :  { %660 = vmatprep.subr.mxu1 %v129_v41  ;;  %626 = vmatpush3.msra.mxu0 %v81_v42  ;;  %v76_v3 = vld [vmem:[#allocation5] sm:$0xff]  ;;  %v203_v9 = vld [vmem:[#allocation5 + $0x3f8] sm:$0xff]  ;;  %v202_v13 = vld [vmem:[#allocation5 + $0x3f0] sm:$0xff] }
  0x3d   :  { %661 = vmatpush3.msra.mxu1 %v113_v43  ;;  %627 = vmatprep.subr.mxu0 %v96_v44  ;;  %v108_v5 = vld [vmem:[#allocation5 + $0x100] sm:$0xff]  ;;  %v155_v10 = vld [vmem:[#allocation5 + $0x278] sm:$0xff]  ;;  %v154_v14 = vld [vmem:[#allocation5 + $0x270] sm:$0xff] }
  0x3e   :  { %662 = vmatprep.subr.mxu1 %v128_v45  ;;  %628 = vmatpush3.msra.mxu0 %v80_v46  ;;  %v187_v11 = vld [vmem:[#allocation5 + $0x378] sm:$0xff]  ;;  %v186_v15 = vld [vmem:[#allocation5 + $0x370] sm:$0xff]  ;;  %v169_v16 = vld [vmem:[#allocation5 + $0x2e8] sm:$0xff] }
  0x3f   :  { %663 = vmatpush3.msra.mxu1 %v112_v47  ;;  %629 = vmatprep.subr.mxu0 %v95_v48  ;;  %v201_v17 = vld [vmem:[#allocation5 + $0x3e8] sm:$0xff]  ;;  %v168_v20 = vld [vmem:[#allocation5 + $0x2e0] sm:$0xff]  ;;  %v167_v24 = vld [vmem:[#allocation5 + $0x2d8] sm:$0xff] }
  0x40   :  { %664 = vmatprep.subr.mxu1 %v127_v49  ;;  %630 = vmatpush3.msra.mxu0 %v79_v50  ;;  %v153_v18 = vld [vmem:[#allocation5 + $0x268] sm:$0xff]  ;;  %v200_v21 = vld [vmem:[#allocation5 + $0x3e0] sm:$0xff]  ;;  %v199_v25 = vld [vmem:[#allocation5 + $0x3d8] sm:$0xff] }
  0x41   :  { %665 = vmatpush3.msra.mxu1 %v111_v51  ;;  %631 = vmatprep.subr.mxu0 %v94_v52  ;;  %v185_v19 = vld [vmem:[#allocation5 + $0x368] sm:$0xff]  ;;  %v152_v22 = vld [vmem:[#allocation5 + $0x260] sm:$0xff]  ;;  %v151_v26 = vld [vmem:[#allocation5 + $0x258] sm:$0xff] }
  0x42   :  { %666 = vmatprep.subr.mxu1 %v126_v53  ;;  %632 = vmatpush3.msra.mxu0 %v78_v54  ;;  %v184_v23 = vld [vmem:[#allocation5 + $0x360] sm:$0xff]  ;;  %v183_v27 = vld [vmem:[#allocation5 + $0x358] sm:$0xff]  ;;  %v166_v28 = vld [vmem:[#allocation5 + $0x2d0] sm:$0xff] }
  0x43   :  { %667 = vmatpush3.msra.mxu1 %v110_v55  ;;  %633 = vmatprep.subr.mxu0 %v93_v57  ;;  %v198_v29 = vld [vmem:[#allocation5 + $0x3d0] sm:$0xff]  ;;  %v165_v32 = vld [vmem:[#allocation5 + $0x2c8] sm:$0xff]  ;;  %v164_v36 = vld [vmem:[#allocation5 + $0x2c0] sm:$0xff] }
  0x44   :  { %668 = vmatprep.subr.mxu1 %v125_v58  ;;  %634 = vmatpush3.msra.mxu0 %v77_v60  ;;  %v150_v30 = vld [vmem:[#allocation5 + $0x250] sm:$0xff]  ;;  %v197_v33 = vld [vmem:[#allocation5 + $0x3c8] sm:$0xff]  ;;  %v196_v37 = vld [vmem:[#allocation5 + $0x3c0] sm:$0xff] }
  0x45   :  { %669 = vmatpush3.msra.mxu1 %v109_v61  ;;  %635 = vmatprep.subr.mxu0 %v92_v63  ;;  %v182_v31 = vld [vmem:[#allocation5 + $0x350] sm:$0xff]  ;;  %v149_v34 = vld [vmem:[#allocation5 + $0x248] sm:$0xff]  ;;  %v148_v38 = vld [vmem:[#allocation5 + $0x240] sm:$0xff] }
  0x46   :  { %670 = vmatprep.subr.mxu1 %v124_v0  ;;  %636 = vmatpush3.msra.mxu0 %v76_v3  ;;  %v181_v35 = vld [vmem:[#allocation5 + $0x348] sm:$0xff]  ;;  %v180_v39 = vld [vmem:[#allocation5 + $0x340] sm:$0xff]  ;;  %v163_v40 = vld [vmem:[#allocation5 + $0x2b8] sm:$0xff] }
  0x47   :  { %275 = vmatprep.mubr.f32.mxu0 %v69_v1  ;;  %671 = vmatpush3.msra.mxu1 %v108_v5  ;;  %v195_v41 = vld [vmem:[#allocation5 + $0x3b8] sm:$0xff]  ;;  %v162_v44 = vld [vmem:[#allocation5 + $0x2b0] sm:$0xff]  ;;  %v161_v48 = vld [vmem:[#allocation5 + $0x2a8] sm:$0xff] }
  0x48   :  { %276 = vmatmul.mubr.f32.vlgmr.msra.gmra.mxu0 %v68_v4  ;;  %345 = vmatprep.mubr.f32.mxu1 %v71_v6  ;;  %v147_v42 = vld [vmem:[#allocation5 + $0x238] sm:$0xff]  ;;  %v194_v45 = vld [vmem:[#allocation5 + $0x3b0] sm:$0xff]  ;;  %v193_v49 = vld [vmem:[#allocation5 + $0x3a8] sm:$0xff] }
  0x49   :  { %675 = vmatprep.subr.mxu0 %v171_v7  ;;  %710 = vmatprep.subr.mxu1 %v203_v9  ;;  %v179_v43 = vld [vmem:[#allocation5 + $0x338] sm:$0xff]  ;;  %v146_v46 = vld [vmem:[#allocation5 + $0x230] sm:$0xff]  ;;  %v145_v50 = vld [vmem:[#allocation5 + $0x228] sm:$0xff] }
  0x4a   :  { %346 = vmatmul.mubr.f32.vlgmr.msra.gmra.mxu1 %v70_v8  ;;  %676 = vmatpush3.msra.mxu0 %v155_v10  ;;  %v178_v47 = vld [vmem:[#allocation5 + $0x330] sm:$0xff]  ;;  %v177_v51 = vld [vmem:[#allocation5 + $0x328] sm:$0xff]  ;;  %v160_v52 = vld [vmem:[#allocation5 + $0x2a0] sm:$0xff] }
  0x4b   :  { %711 = vmatpush3.msra.mxu1 %v187_v11  ;;  %677 = vmatprep.subr.mxu0 %v170_v12  ;;  %v192_v53 = vld [vmem:[#allocation5 + $0x3a0] sm:$0xff]  ;;  %v159_v56 = vld [vmem:[#allocation5 + $0x298] sm:$0xff]  ;;  %v158_v60 = vld [vmem:[#allocation5 + $0x290] sm:$0xff] }
  0x4c   :  { %712 = vmatprep.subr.mxu1 %v202_v13  ;;  %678 = vmatpush3.msra.mxu0 %v154_v14  ;;  %v144_v54 = vld [vmem:[#allocation5 + $0x220] sm:$0xff]  ;;  %v191_v57 = vld [vmem:[#allocation5 + $0x398] sm:$0xff]  ;;  %v190_v61 = vld [vmem:[#allocation5 + $0x390] sm:$0xff] }
  0x4d   :  { %713 = vmatpush3.msra.mxu1 %v186_v15  ;;  %679 = vmatprep.subr.mxu0 %v169_v16  ;;  %v176_v55 = vld [vmem:[#allocation5 + $0x320] sm:$0xff]  ;;  %v143_v58 = vld [vmem:[#allocation5 + $0x218] sm:$0xff]  ;;  %v142_v62 = vld [vmem:[#allocation5 + $0x210] sm:$0xff] }
  0x4e   :  { %714 = vmatprep.subr.mxu1 %v201_v17  ;;  %680 = vmatpush3.msra.mxu0 %v153_v18  ;;  %v175_v59 = vld [vmem:[#allocation5 + $0x318] sm:$0xff]  ;;  %v174_v63 = vld [vmem:[#allocation5 + $0x310] sm:$0xff]  ;;  %v157_v0 = vld [vmem:[#allocation5 + $0x288] sm:$0xff]  ;;  %v896_v17 = vmov 0.0  }
  0x4f   :  { %715 = vmatpush3.msra.mxu1 %v185_v19  ;;  %681 = vmatprep.subr.mxu0 %v168_v20  ;;  %v65_v1 = vld [vmem:[#allocation2 + $0x28] sm:$0xff]  ;;  %v67_v4 = vld [vmem:[#allocation2 + $0x38] sm:$0xff]  ;;  %v64_v6 = vld [vmem:[#allocation2 + $0x20] sm:$0xff] }
  0x50   :  { %716 = vmatprep.subr.mxu1 %v200_v21  ;;  %682 = vmatpush3.msra.mxu0 %v152_v22  ;;  %v189_v2 = vld [vmem:[#allocation5 + $0x388] sm:$0xff]  ;;  %v66_v7 = vld [vmem:[#allocation2 + $0x30] sm:$0xff]  ;;  %v156_v8 = vld [vmem:[#allocation5 + $0x280] sm:$0xff]  ;;  %v73_v10 = vcvt.s32.f32 %v65_v1  ;;  %v75_v12 = vcvt.s32.f32 %v67_v4  ;;  %v72_v14 = vcvt.s32.f32 %v64_v6 }
  0x51   :  { %717 = vmatpush3.msra.mxu1 %v184_v23  ;;  %683 = vmatprep.subr.mxu0 %v167_v24  ;;  %v141_v3 = vld [vmem:[#allocation5 + $0x208] sm:$0xff]  ;;  %v188_v9 = vld [vmem:[#allocation5 + $0x380] sm:$0xff]  ;;  %v74_v15 = vcvt.s32.f32 %v66_v7  ;;  %v507_v16 = vld [vmem:[#allocation7 + $0x78] sm:$0xff] }
  0x52   :  { %718 = vmatprep.subr.mxu1 %v199_v25  ;;  %684 = vmatpush3.msra.mxu0 %v151_v26  ;;  %v173_v5 = vld [vmem:[#allocation5 + $0x308] sm:$0xff]  ;;  %v140_v11 = vld [vmem:[#allocation5 + $0x200] sm:$0xff]  ;;  %v506_v18 = vld [vmem:[#allocation7 + $0x70] sm:$0xff] }
  0x53   :  { %719 = vmatpush3.msra.mxu1 %v183_v27  ;;  %685 = vmatprep.subr.mxu0 %v166_v28  ;;  %v172_v13 = vld [vmem:[#allocation5 + $0x300] sm:$0xff]  ;;  %v505_v19 = vld [vmem:[#allocation7 + $0x68] sm:$0xff]  ;;  %v503_v21 = vld [vmem:[#allocation7 + $0x58] sm:$0xff] }
  0x54   :  { %720 = vmatprep.subr.mxu1 %v198_v29  ;;  %686 = vmatpush3.msra.mxu0 %v150_v30  ;;  %v504_v20 = vld [vmem:[#allocation7 + $0x60] sm:$0xff]  ;;  %v502_v22 = vld [vmem:[#allocation7 + $0x50] sm:$0xff]  ;;  %v501_v23 = vld [vmem:[#allocation7 + $0x48] sm:$0xff] }
  0x55   :  { %721 = vmatpush3.msra.mxu1 %v182_v31  ;;  %687 = vmatprep.subr.mxu0 %v165_v32  ;;  %v500_v24 = vld [vmem:[#allocation7 + $0x40] sm:$0xff]  ;;  %v499_v25 = vld [vmem:[#allocation7 + $0x38] sm:$0xff]  ;;  %v498_v26 = vld [vmem:[#allocation7 + $0x30] sm:$0xff] }
  0x56   :  { %722 = vmatprep.subr.mxu1 %v197_v33  ;;  %688 = vmatpush3.msra.mxu0 %v149_v34  ;;  %v497_v27 = vld [vmem:[#allocation7 + $0x28] sm:$0xff]  ;;  %v496_v28 = vld [vmem:[#allocation7 + $0x20] sm:$0xff]  ;;  %v495_v29 = vld [vmem:[#allocation7 + $0x18] sm:$0xff] }
  0x57   :  { %723 = vmatpush3.msra.mxu1 %v181_v35  ;;  %689 = vmatprep.subr.mxu0 %v164_v36  ;;  %v494_v30 = vld [vmem:[#allocation7 + $0x10] sm:$0xff]  ;;  %v493_v31 = vld [vmem:[#allocation7 + $0x8] sm:$0xff]  ;;  %v492_v32 = vld [vmem:[#allocation7] sm:$0xff] }
  0x58   :  { %724 = vmatprep.subr.mxu1 %v196_v37  ;;  %690 = vmatpush3.msra.mxu0 %v148_v38  ;;  %v603_v37 = vld [vmem:[%s950_s3] ss:$0 sm:$0xff]  ;;  %s898_s3 = smov [#allocation8]  }
  0x59   :  { %725 = vmatpush3.msra.mxu1 %v180_v39  ;;  %691 = vmatprep.subr.mxu0 %v163_v40  ;;  %s593_s11 = sshll.u32 %s898_s3, 4  ;;  %s594_s11 = int_to_ptr.vmem [resolvable:$true] %s593_s11 }
  0x5a   :  { %726 = vmatprep.subr.mxu1 %v195_v41  ;;  %692 = vmatpush3.msra.mxu0 %v147_v42  ;;  %s865_s12 = scalar_lea.vmem %s594_s11, 128  ;;  %p870_p2 = scmp.lt.s32.totalorder %s594_s11, %s594_s11 }
  0x5b   :  { %727 = vmatpush3.msra.mxu1 %v179_v43  ;;  %693 = vmatprep.subr.mxu0 %v162_v44  ;;  %p866_p1 = scmp.ne.s32.totalorder %s594_s11, %s865_s12  ;;  %p871_p3 = scmp.lt.s32.totalorder %s865_s12, %s865_s12 }
  0x5c   :  { %728 = vmatprep.subr.mxu1 %v194_v45  ;;  %694 = vmatpush3.msra.mxu0 %v146_v46 }
  0x5d   :  { %729 = vmatpush3.msra.mxu1 %v178_v47  ;;  %695 = vmatprep.subr.mxu0 %v161_v48  ;;  %p872_p4 = por %p871_p3, %p870_p2 }
  0x5e   :  { %730 = vmatprep.subr.mxu1 %v193_v49  ;;  %696 = vmatpush3.msra.mxu0 %v145_v50 }
  0x5f   :  { %731 = vmatpush3.msra.mxu1 %v177_v51  ;;  %697 = vmatprep.subr.mxu0 %v160_v52  ;;  %v604_v51 = vld [vmem:[%s951_s4] ss:$0 sm:$0xff]  ;;  %p873_p5 = pnand %p872_p4, %p866_p1 }
  0x60   :  { %732 = vmatprep.subr.mxu1 %v192_v53  ;;  %698 = vmatpush3.msra.mxu0 %v144_v54 }
  0x61   :  { %733 = vmatpush3.msra.mxu1 %v176_v55  ;;  %699 = vmatprep.subr.mxu0 %v159_v56 }
  0x62   :  { %734 = vmatprep.subr.mxu1 %v191_v57  ;;  %700 = vmatpush3.msra.mxu0 %v143_v58 }
  0x63   :  { %735 = vmatpush3.msra.mxu1 %v175_v59  ;;  %701 = vmatprep.subr.mxu0 %v158_v60 }
  0x64   :  { %736 = vmatprep.subr.mxu1 %v190_v61  ;;  %702 = vmatpush3.msra.mxu0 %v142_v62 }
  0x65   :  { %737 = vmatpush3.msra.mxu1 %v174_v63  ;;  %703 = vmatprep.subr.mxu0 %v157_v0 }
  0x66   :  { %738 = vmatprep.subr.mxu1 %v189_v2  ;;  %704 = vmatpush3.msra.mxu0 %v141_v3 }
  0x67   :  { %739 = vmatpush3.msra.mxu1 %v173_v5  ;;  %705 = vmatprep.subr.mxu0 %v156_v8 }
  0x68   :  { %740 = vmatprep.subr.mxu1 %v188_v9  ;;  %706 = vmatpush3.msra.mxu0 %v140_v11 }
  0x69   :  { %415 = vmatprep.mubr.f32.mxu0 %v73_v10  ;;  %741 = vmatpush3.msra.mxu1 %v172_v13 }
  0x6a   :  { %485 = vmatprep.mubr.f32.mxu1 %v75_v12  ;;  %416 = vmatmul.mubr.f32.vlgmr.msra.gmra.mxu0 %v72_v14 }
  0x6b   :  { %486 = vmatmul.mubr.f32.vlgmr.msra.gmra.mxu1 %v74_v15  ;;  %762 = vmatprep.subr.mxu0 %v896_v17 }
  0x6c   :  { %763 = vmatpush3.msra.mxu0 %v507_v16  ;;  %794 = vmatprep.mubr.msk.f32.mxu0 %vm897_vm0, %v896_v17 }
  0x6d   :  { %764 = vmatprep.subr.mxu0 %v896_v17 }
  0x6e   :  { %765 = vmatpush3.msra.mxu0 %v506_v18 }
  0x6f   :  { %766 = vmatprep.subr.mxu0 %v896_v17 }
  0x70   :  { %767 = vmatpush3.msra.mxu0 %v505_v19 }
  0x71   :  { %768 = vmatprep.subr.mxu0 %v896_v17 }
  0x72   :  { %769 = vmatpush3.msra.mxu0 %v504_v20 }
  0x73   :  { %770 = vmatprep.subr.mxu0 %v896_v17 }
  0x74   :  { %771 = vmatpush3.msra.mxu0 %v503_v21 }
  0x75   :  { %772 = vmatprep.subr.mxu0 %v896_v17 }
  0x76   :  { %773 = vmatpush3.msra.mxu0 %v502_v22 }
  0x77   :  { %774 = vmatprep.subr.mxu0 %v896_v17 }
  0x78   :  { %775 = vmatpush3.msra.mxu0 %v501_v23 }
  0x79   :  { %776 = vmatprep.subr.mxu0 %v896_v17 }
  0x7a   :  { %777 = vmatpush3.msra.mxu0 %v500_v24 }
  0x7b   :  { %778 = vmatprep.subr.mxu0 %v896_v17 }
  0x7c   :  { %779 = vmatpush3.msra.mxu0 %v499_v25 }
  0x7d   :  { %780 = vmatprep.subr.mxu0 %v896_v17 }
  0x7e   :  { %781 = vmatpush3.msra.mxu0 %v498_v26 }
  0x7f   :  { %782 = vmatprep.subr.mxu0 %v896_v17 }
  0x80   :  { %783 = vmatpush3.msra.mxu0 %v497_v27 }
  0x81   :  { %784 = vmatprep.subr.mxu0 %v896_v17 }
  0x82   :  { %785 = vmatpush3.msra.mxu0 %v496_v28 }
  0x83   :  { %786 = vmatprep.subr.mxu0 %v896_v17 }
  0x84   :  { %787 = vmatpush3.msra.mxu0 %v495_v29 }
  0x85   :  { %788 = vmatprep.subr.mxu0 %v896_v17 }
  0x86   :  { %789 = vmatpush3.msra.mxu0 %v494_v30 }
  0x87   :  { %790 = vmatprep.subr.mxu0 %v896_v17 }
  0x88   :  { %791 = vmatpush3.msra.mxu0 %v493_v31 }
  0x89   :  { %792 = vmatprep.subr.mxu0 %v896_v17 }
  0x8a   :  { %793 = vmatpush3.msra.mxu0 %v492_v32 }
 0x108   :  { %v637_v33 = vpop.f32.mrf.mxu0 }
 0x10a   :  { %v672_v34 = vpop.f32.mrf.mxu1  ;;  %v638_v35 = vpop.f32.mrf.mxu0 }
 0x10b   :  { %v639_v36 = vadd.f32 %v638_v35, %v637_v33 }
 0x10c   :  { %v673_v38 = vpop.f32.mrf.mxu1 }
 0x10d   :  { %v278_v39 = vadd.f32 %v639_v36, %v603_v37  ;;  %v674_v40 = vadd.f32 %v673_v38, %v672_v34 }
 0x10f   :  { %v348_v45 = vadd.f32 %v674_v40, %v278_v39 }
 0x12a   :  { %v707_v41 = vpop.f32.mrf.mxu0 }
 0x12b   :  { %v742_v42 = vpop.f32.mrf.mxu1 }
 0x12c   :  { %v708_v43 = vpop.f32.mrf.mxu0 }
 0x12d   :  { %v743_v44 = vpop.f32.mrf.mxu1  ;;  %v709_v46 = vadd.f32 %v708_v43, %v707_v41 }
 0x12e   :  { %v744_v48 = vadd.f32 %v743_v44, %v742_v42 }
 0x12f   :  { %v418_v47 = vadd.f32 %v709_v46, %v348_v45 }
 0x131   :  { %v488_v49 = vadd.f32 %v744_v48, %v418_v47 }
 0x133   :  { %v491_v50 = vmax.f32 %v488_v49, 0.0 }
 0x135   :  { %795 = vmatmul.mubr.f32.vlgmr.msra.gmra.mxu0 %v491_v50 }
 0x1f5   :  { %v581_v52 = vpop.f32.mrf.mxu0 }
 0x1f6   :  { %v582_v53 = vadd.f32 %v604_v51, %v581_v52 }
 0x1f7   :  { %v796_v54 = vpop.f32.mrf.mxu0 }
 0x1f8   :  { %v585_v55 = vmax.f32 %v582_v53, 0.0 }
 0x1fa   :  { %586 = vst [vmem:[#allocation8] sm:$0xff] %v585_v55 }
 0x1fb   :  { %876 = shalt.err (!%p873_p5)
}
 0x1fc   :  { %596 = dma.vmem_to_hbm [thread:$0]  %s594_s11, 128, %s952_s5, [#allocation4]  }
 0x1fd   :  { %889 = dma.done.wait [#allocation4], 128  }
 0x1fe   :  { %890 = vsyncadd [#allocation4], 4294967168 }
 0x1ff   :  { %600 = vsyncpa [#allocation3], 1 }
 0x200   :  { %601 = vsyncpa [#allocation6], 1 }
 0x201   :  { %602 = vsyncpa [#allocation4], 1 }

// kernel: tpu_custom_call.1
= control target key start
LH: loop header
LB: loop body
LE: loop exit
PB: predicated region body
PF: predicated region fallthrough
CT: control target
= control target key end

     0   :  { %10 = vsyncpa [#allocation3], 0  ;;  %s947_s0 = inlined_call_operand.hbm [shape: s32[8,1024], index: 0, kind: input, shape index: {}]   ;;  %s948_s1 = inlined_call_operand.hbm [shape: f32[1024,128], index: 1, kind: input, shape index: {}]   ;;  %s949_s2 = inlined_call_operand.hbm [shape: f32[128,128], index: 2, kind: input, shape index: {}]   ;;  %s950_s3 = inlined_call_operand.vmem [shape: f32[1,128], index: 3, kind: input, shape index: {}]   ;;  %s951_s4 = inlined_call_operand.vmem [shape: f32[1,128], index: 4, kind: input, shape index: {}]   ;;  %s952_s5 = inlined_call_operand.hbm [shape: f32[8,128], index: 5, kind: output, shape index: {}]  }
   0x1   :  { %11 = vsyncpa [#allocation6], 0 }
   0x2   :  { %12 = vsyncpa [#allocation4], 0  ;;  %s891_s18 = smov [#allocation5]  }
   0x3   :  { %s28_s19 = sshll.u32 %s891_s18, 4  ;;  %s29_s19 = int_to_ptr.vmem [resolvable:$true] %s28_s19 }
   0x4   :  { %s813_s20 = scalar_lea.vmem %s29_s19, 16384  ;;  %p818_p1 = scmp.lt.s32.totalorder %s29_s19, %s29_s19 }
   0x5   :  { %p814_p0 = scmp.ne.s32.totalorder %s29_s19, %s813_s20  ;;  %p819_p2 = scmp.lt.s32.totalorder %s813_s20, %s813_s20 }
   0x7   :  { %p820_p3 = por %p819_p2, %p818_p1 }
   0x9   :  { %p821_p4 = pnand %p820_p3, %p814_p0 }
   0xb   :  { %824 = shalt.err (!%p821_p4)
}
   0xc   :  { %s892_s21 = smov 128   ;;  %s893_s22 = smov 8  }
   0xd   :  { %34 = dma.hbm_to_vmem [thread:$0]  %s948_s1, 16384, %s29_s19, [#allocation6], %s892_s21, %s892_s21, %s893_s22  }
   0xe   :  { %s894_s25 = smov [#allocation2]   ;;  %s895_s27 = smov [#allocation7]  }
   0xf   :  { %s19_s26 = sshll.u32 %s894_s25, 4  ;;  %s40_s28 = sshll.u32 %s895_s27, 4  ;;  %s20_s26 = int_to_ptr.vmem [resolvable:$true] %s19_s26  ;;  %s41_s28 = int_to_ptr.vmem [resolvable:$true] %s40_s28 }
  0x10   :  { %s833_s29 = scalar_lea.vmem %s20_s26, 1024  ;;  %p838_p6 = scmp.lt.s32.totalorder %s20_s26, %s20_s26 }
  0x11   :  { %p834_p5 = scmp.ne.s32.totalorder %s20_s26, %s833_s29  ;;  %p839_p7 = scmp.lt.s32.totalorder %s833_s29, %s833_s29 }
  0x13   :  { %p840_p8 = por %p839_p7, %p838_p6 }
  0x15   :  { %p841_p9 = pnand %p840_p8, %p834_p5 }
  0x17   :  { %844 = shalt.err (!%p841_p9)
}
  0x18   :  { %22 = dma.hbm_to_vmem [thread:$0]  %s947_s0, 1024, %s20_s26, [#allocation3]  }
  0x19   :  { %s853_s7 = scalar_lea.vmem %s41_s28, 2048  ;;  %p858_p11 = scmp.lt.s32.totalorder %s41_s28, %s41_s28 }
  0x1a   :  { %p854_p10 = scmp.ne.s32.totalorder %s41_s28, %s853_s7  ;;  %p859_p12 = scmp.lt.s32.totalorder %s853_s7, %s853_s7 }
  0x1c   :  { %p860_p13 = por %p859_p12, %p858_p11 }
  0x1e   :  { %p861_p0 = pnand %p860_p13, %p854_p10 }
  0x20   :  { %864 = shalt.err (!%p861_p0)
}
  0x21   :  { %46 = dma.hbm_to_vmem [thread:$0]  %s949_s2, 2048, %s41_s28, [#allocation6], %s892_s21, %s892_s21, %s893_s22  }
  0x22   :  { %885 = dma.done.wait [#allocation3], 1024  }
  0x23   :  { %886 = vsyncadd [#allocation3], 4294966272 }
  0x24   :  { %887 = dma.done.wait [#allocation6], 18432  }
  0x25   :  { %888 = vsyncadd [#allocation6], 4294948864  ;;  %v107_v0 = vld [vmem:[#allocation5 + $0xf8] sm:$0xff]  ;;  %v106_v4 = vld [vmem:[#allocation5 + $0xf0] sm:$0xff]  ;;  %vm897_vm0 = vmmov 0  }
  0x26   :  { %v139_v1 = vld [vmem:[#allocation5 + $0x1f8] sm:$0xff]  ;;  %605 = vmatprep.subr.mxu0 %v107_v0  ;;  %v138_v5 = vld [vmem:[#allocation5 + $0x1f0] sm:$0xff]  ;;  %v105_v8 = vld [vmem:[#allocation5 + $0xe8] sm:$0xff] }
  0x27   :  { %v91_v2 = vld [vmem:[#allocation5 + $0x78] sm:$0xff]  ;;  %640 = vmatprep.subr.mxu1 %v139_v1  ;;  %v90_v6 = vld [vmem:[#allocation5 + $0x70] sm:$0xff]  ;;  %v137_v9 = vld [vmem:[#allocation5 + $0x1e8] sm:$0xff] }
  0x28   :  { %v123_v3 = vld [vmem:[#allocation5 + $0x178] sm:$0xff]  ;;  %606 = vmatpush3.msra.mxu0 %v91_v2  ;;  %v122_v7 = vld [vmem:[#allocation5 + $0x170] sm:$0xff]  ;;  %v89_v10 = vld [vmem:[#allocation5 + $0x68] sm:$0xff] }
  0x29   :  { %641 = vmatpush3.msra.mxu1 %v123_v3  ;;  %607 = vmatprep.subr.mxu0 %v106_v4  ;;  %v121_v11 = vld [vmem:[#allocation5 + $0x168] sm:$0xff]  ;;  %v104_v12 = vld [vmem:[#allocation5 + $0xe0] sm:$0xff]  ;;  %v103_v16 = vld [vmem:[#allocation5 + $0xd8] sm:$0xff] }
  0x2a   :  { %642 = vmatprep.subr.mxu1 %v138_v5  ;;  %608 = vmatpush3.msra.mxu0 %v90_v6  ;;  %v136_v13 = vld [vmem:[#allocation5 + $0x1e0] sm:$0xff]  ;;  %v135_v17 = vld [vmem:[#allocation5 + $0x1d8] sm:$0xff]  ;;  %v102_v20 = vld [vmem:[#allocation5 + $0xd0] sm:$0xff] }
  0x2b   :  { %643 = vmatpush3.msra.mxu1 %v122_v7  ;;  %609 = vmatprep.subr.mxu0 %v105_v8  ;;  %v88_v14 = vld [vmem:[#allocation5 + $0x60] sm:$0xff]  ;;  %v87_v18 = vld [vmem:[#allocation5 + $0x58] sm:$0xff]  ;;  %v134_v21 = vld [vmem:[#allocation5 + $0x1d0] sm:$0xff] }
  0x2c   :  { %644 = vmatprep.subr.mxu1 %v137_v9  ;;  %v120_v15 = vld [vmem:[#allocation5 + $0x160] sm:$0xff]  ;;  %610 = vmatpush3.msra.mxu0 %v89_v10  ;;  %v119_v19 = vld [vmem:[#allocation5 + $0x158] sm:$0xff]  ;;  %v86_v22 = vld [vmem:[#allocation5 + $0x50] sm:$0xff] }
  0x2d   :  { %645 = vmatpush3.msra.mxu1 %v121_v11  ;;  %611 = vmatprep.subr.mxu0 %v104_v12  ;;  %v118_v23 = vld [vmem:[#allocation5 + $0x150] sm:$0xff]  ;;  %v101_v24 = vld [vmem:[#allocation5 + $0xc8] sm:$0xff]  ;;  %v100_v28 = vld [vmem:[#allocation5 + $0xc0] sm:$0xff] }
  0x2e   :  { %646 = vmatprep.subr.mxu1 %v136_v13  ;;  %612 = vmatpush3.msra.mxu0 %v88_v14  ;;  %v133_v25 = vld [vmem:[#allocation5 + $0x1c8] sm:$0xff]  ;;  %v132_v29 = vld [vmem:[#allocation5 + $0x1c0] sm:$0xff]  ;;  %v99_v32 = vld [vmem:[#allocation5 + $0xb8] sm:$0xff] }
  0x2f   :  { %647 = vmatpush3.msra.mxu1 %v120_v15  ;;  %613 = vmatprep.subr.mxu0 %v103_v16  ;;  %v85_v26 = vld [vmem:[#allocation5 + $0x48] sm:$0xff]  ;;  %v84_v30 = vld [vmem:[#allocation5 + $0x40] sm:$0xff]  ;;  %v131_v33 = vld [vmem:[#allocation5 + $0x1b8] sm:$0xff] }
  0x30   :  { %648 = vmatprep.subr.mxu1 %v135_v17  ;;  %614 = vmatpush3.msra.mxu0 %v87_v18  ;;  %v117_v27 = vld [vmem:[#allocation5 + $0x148] sm:$0xff]  ;;  %v116_v31 = vld [vmem:[#allocation5 + $0x140] sm:$0xff]  ;;  %v83_v34 = vld [vmem:[#allocation5 + $0x38] sm:$0xff] }
  0x31   :  { %649 = vmatpush3.msra.mxu1 %v119_v19  ;;  %615 = vmatprep.subr.mxu0 %v102_v20  ;;  %v115_v35 = vld [vmem:[#allocation5 + $0x138] sm:$0xff]  ;;  %v98_v36 = vld [vmem:[#allocation5 + $0xb0] sm:$0xff]  ;;  %v97_v40 = vld [vmem:[#allocation5 + $0xa8] sm:$0xff] }
  0x32   :  { %650 = vmatprep.subr.mxu1 %v134_v21  ;;  %616 = vmatpush3.msra.mxu0 %v86_v22  ;;  %v130_v37 = vld [vmem:[#allocation5 + $0x1b0] sm:$0xff]  ;;  %v129_v41 = vld [vmem:[#allocation5 + $0x1a8] sm:$0xff]  ;;  %v96_v44 = vld [vmem:[#allocation5 + $0xa0] sm:$0xff] }
  0x33   :  { %651 = vmatpush3.msra.mxu1 %v118_v23  ;;  %617 = vmatprep.subr.mxu0 %v101_v24  ;;  %v82_v38 = vld [vmem:[#allocation5 + $0x30] sm:$0xff]  ;;  %v81_v42 = vld [vmem:[#allocation5 + $0x28] sm:$0xff]  ;;  %v128_v45 = vld [vmem:[#allocation5 + $0x1a0] sm:$0xff] }
  0x34   :  { %652 = vmatprep.subr.mxu1 %v133_v25  ;;  %618 = vmatpush3.msra.mxu0 %v85_v26  ;;  %v114_v39 = vld [vmem:[#allocation5 + $0x130] sm:$0xff]  ;;  %v113_v43 = vld [vmem:[#allocation5 + $0x128] sm:$0xff]  ;;  %v80_v46 = vld [vmem:[#allocation5 + $0x20] sm:$0xff] }
  0x35   :  { %653 = vmatpush3.msra.mxu1 %v117_v27  ;;  %619 = vmatprep.subr.mxu0 %v100_v28  ;;  %v112_v47 = vld [vmem:[#allocation5 + $0x120] sm:$0xff]  ;;  %v95_v48 = vld [vmem:[#allocation5 + $0x98] sm:$0xff]  ;;  %v94_v52 = vld [vmem:[#allocation5 + $0x90] sm:$0xff] }
  0x36   :  { %654 = vmatprep.subr.mxu1 %v132_v29  ;;  %620 = vmatpush3.msra.mxu0 %v84_v30  ;;  %v127_v49 = vld [vmem:[#allocation5 + $0x198] sm:$0xff]  ;;  %v126_v53 = vld [vmem:[#allocation5 + $0x190] sm:$0xff]  ;;  %v61_v56 = vld [vmem:[#allocation2 + $0x8] sm:$0xff] }
  0x37   :  { %655 = vmatpush3.msra.mxu1 %v116_v31  ;;  %621 = vmatprep.subr.mxu0 %v99_v32  ;;  %v79_v50 = vld [vmem:[#allocation5 + $0x18] sm:$0xff]  ;;  %v78_v54 = vld [vmem:[#allocation5 + $0x10] sm:$0xff]  ;;  %v93_v57 = vld [vmem:[#allocation5 + $0x88] sm:$0xff]  ;;  %v69_v1 = vcvt.s32.f32 %v61_v56 }
  0x38   :  { %656 = vmatprep.subr.mxu1 %v131_v33  ;;  %622 = vmatpush3.msra.mxu0 %v83_v34  ;;  %v111_v51 = vld [vmem:[#allocation5 + $0x118] sm:$0xff]  ;;  %v110_v55 = vld [vmem:[#allocation5 + $0x110] sm:$0xff]  ;;  %v125_v58 = vld [vmem:[#allocation5 + $0x188] sm:$0xff] }
  0x39   :  { %657 = vmatpush3.msra.mxu1 %v115_v35  ;;  %623 = vmatprep.subr.mxu0 %v98_v36  ;;  %v60_v59 = vld [vmem:[#allocation2] sm:$0xff]  ;;  %v77_v60 = vld [vmem:[#allocation5 + $0x8] sm:$0xff]  ;;  %v63_v62 = vld [vmem:[#allocation2 + $0x18] sm:$0xff] }
  0x3a   :  { %658 = vmatprep.subr.mxu1 %v130_v37  ;;  %624 = vmatpush3.msra.mxu0 %v82_v38  ;;  %v109_v61 = vld [vmem:[#allocation5 + $0x108] sm:$0xff]  ;;  %v92_v63 = vld [vmem:[#allocation5 + $0x80] sm:$0xff]  ;;  %v62_v2 = vld [vmem:[#allocation2 + $0x10] sm:$0xff]  ;;  %v68_v4 = vcvt.s32.f32 %v60_v59  ;;  %v71_v6 = vcvt.s32.f32 %v63_v62 }
  0x3b   :  { %659 = vmatpush3.msra.mxu1 %v114_v39  ;;  %625 = vmatprep.subr.mxu0 %v97_v40  ;;  %v124_v0 = vld [vmem:[#allocation5 + $0x180] sm:$0xff]  ;;  %v171_v7 = vld [vmem:[#allocation5 + $0x2f8] sm:$0xff]  ;;  %v70_v8 = vcvt.s32.f32 %v62_v2  ;;  %v170_v12 = vld [vmem:[#allocation5 + $0x2f0] sm:$0xff] }
  0x3c   :  { %660 = vmatprep.subr.mxu1 %v129_v41  ;;  %626 = vmatpush3.msra.mxu0 %v81_v42  ;;  %v76_v3 = vld [vmem:[#allocation5] sm:$0xff]  ;;  %v203_v9 = vld [vmem:[#allocation5 + $0x3f8] sm:$0xff]  ;;  %v202_v13 = vld [vmem:[#allocation5 + $0x3f0] sm:$0xff] }
  0x3d   :  { %661 = vmatpush3.msra.mxu1 %v113_v43  ;;  %627 = vmatprep.subr.mxu0 %v96_v44  ;;  %v108_v5 = vld [vmem:[#allocation5 + $0x100] sm:$0xff]  ;;  %v155_v10 = vld [vmem:[#allocation5 + $0x278] sm:$0xff]  ;;  %v154_v14 = vld [vmem:[#allocation5 + $0x270] sm:$0xff] }
  0x3e   :  { %662 = vmatprep.subr.mxu1 %v128_v45  ;;  %628 = vmatpush3.msra.mxu0 %v80_v46  ;;  %v187_v11 = vld [vmem:[#allocation5 + $0x378] sm:$0xff]  ;;  %v186_v15 = vld [vmem:[#allocation5 + $0x370] sm:$0xff]  ;;  %v169_v16 = vld [vmem:[#allocation5 + $0x2e8] sm:$0xff] }
  0x3f   :  { %663 = vmatpush3.msra.mxu1 %v112_v47  ;;  %629 = vmatprep.subr.mxu0 %v95_v48  ;;  %v201_v17 = vld [vmem:[#allocation5 + $0x3e8] sm:$0xff]  ;;  %v168_v20 = vld [vmem:[#allocation5 + $0x2e0] sm:$0xff]  ;;  %v167_v24 = vld [vmem:[#allocation5 + $0x2d8] sm:$0xff] }
  0x40   :  { %664 = vmatprep.subr.mxu1 %v127_v49  ;;  %630 = vmatpush3.msra.mxu0 %v79_v50  ;;  %v153_v18 = vld [vmem:[#allocation5 + $0x268] sm:$0xff]  ;;  %v200_v21 = vld [vmem:[#allocation5 + $0x3e0] sm:$0xff]  ;;  %v199_v25 = vld [vmem:[#allocation5 + $0x3d8] sm:$0xff] }
  0x41   :  { %665 = vmatpush3.msra.mxu1 %v111_v51  ;;  %631 = vmatprep.subr.mxu0 %v94_v52  ;;  %v185_v19 = vld [vmem:[#allocation5 + $0x368] sm:$0xff]  ;;  %v152_v22 = vld [vmem:[#allocation5 + $0x260] sm:$0xff]  ;;  %v151_v26 = vld [vmem:[#allocation5 + $0x258] sm:$0xff] }
  0x42   :  { %666 = vmatprep.subr.mxu1 %v126_v53  ;;  %632 = vmatpush3.msra.mxu0 %v78_v54  ;;  %v184_v23 = vld [vmem:[#allocation5 + $0x360] sm:$0xff]  ;;  %v183_v27 = vld [vmem:[#allocation5 + $0x358] sm:$0xff]  ;;  %v166_v28 = vld [vmem:[#allocation5 + $0x2d0] sm:$0xff] }
  0x43   :  { %667 = vmatpush3.msra.mxu1 %v110_v55  ;;  %633 = vmatprep.subr.mxu0 %v93_v57  ;;  %v198_v29 = vld [vmem:[#allocation5 + $0x3d0] sm:$0xff]  ;;  %v165_v32 = vld [vmem:[#allocation5 + $0x2c8] sm:$0xff]  ;;  %v164_v36 = vld [vmem:[#allocation5 + $0x2c0] sm:$0xff] }
  0x44   :  { %668 = vmatprep.subr.mxu1 %v125_v58  ;;  %634 = vmatpush3.msra.mxu0 %v77_v60  ;;  %v150_v30 = vld [vmem:[#allocation5 + $0x250] sm:$0xff]  ;;  %v197_v33 = vld [vmem:[#allocation5 + $0x3c8] sm:$0xff]  ;;  %v196_v37 = vld [vmem:[#allocation5 + $0x3c0] sm:$0xff] }
  0x45   :  { %669 = vmatpush3.msra.mxu1 %v109_v61  ;;  %635 = vmatprep.subr.mxu0 %v92_v63  ;;  %v182_v31 = vld [vmem:[#allocation5 + $0x350] sm:$0xff]  ;;  %v149_v34 = vld [vmem:[#allocation5 + $0x248] sm:$0xff]  ;;  %v148_v38 = vld [vmem:[#allocation5 + $0x240] sm:$0xff] }
  0x46   :  { %670 = vmatprep.subr.mxu1 %v124_v0  ;;  %636 = vmatpush3.msra.mxu0 %v76_v3  ;;  %v181_v35 = vld [vmem:[#allocation5 + $0x348] sm:$0xff]  ;;  %v180_v39 = vld [vmem:[#allocation5 + $0x340] sm:$0xff]  ;;  %v163_v40 = vld [vmem:[#allocation5 + $0x2b8] sm:$0xff] }
  0x47   :  { %275 = vmatprep.mubr.f32.mxu0 %v69_v1  ;;  %671 = vmatpush3.msra.mxu1 %v108_v5  ;;  %v195_v41 = vld [vmem:[#allocation5 + $0x3b8] sm:$0xff]  ;;  %v162_v44 = vld [vmem:[#allocation5 + $0x2b0] sm:$0xff]  ;;  %v161_v48 = vld [vmem:[#allocation5 + $0x2a8] sm:$0xff] }
  0x48   :  { %276 = vmatmul.mubr.f32.vlgmr.msra.gmra.mxu0 %v68_v4  ;;  %345 = vmatprep.mubr.f32.mxu1 %v71_v6  ;;  %v147_v42 = vld [vmem:[#allocation5 + $0x238] sm:$0xff]  ;;  %v194_v45 = vld [vmem:[#allocation5 + $0x3b0] sm:$0xff]  ;;  %v193_v49 = vld [vmem:[#allocation5 + $0x3a8] sm:$0xff] }
  0x49   :  { %675 = vmatprep.subr.mxu0 %v171_v7  ;;  %710 = vmatprep.subr.mxu1 %v203_v9  ;;  %v179_v43 = vld [vmem:[#allocation5 + $0x338] sm:$0xff]  ;;  %v146_v46 = vld [vmem:[#allocation5 + $0x230] sm:$0xff]  ;;  %v145_v50 = vld [vmem:[#allocation5 + $0x228] sm:$0xff] }
  0x4a   :  { %346 = vmatmul.mubr.f32.vlgmr.msra.gmra.mxu1 %v70_v8  ;;  %676 = vmatpush3.msra.mxu0 %v155_v10  ;;  %v178_v47 = vld [vmem:[#allocation5 + $0x330] sm:$0xff]  ;;  %v177_v51 = vld [vmem:[#allocation5 + $0x328] sm:$0xff]  ;;  %v160_v52 = vld [vmem:[#allocation5 + $0x2a0] sm:$0xff] }
  0x4b   :  { %711 = vmatpush3.msra.mxu1 %v187_v11  ;;  %677 = vmatprep.subr.mxu0 %v170_v12  ;;  %v192_v53 = vld [vmem:[#allocation5 + $0x3a0] sm:$0xff]  ;;  %v159_v56 = vld [vmem:[#allocation5 + $0x298] sm:$0xff]  ;;  %v158_v60 = vld [vmem:[#allocation5 + $0x290] sm:$0xff] }
  0x4c   :  { %712 = vmatprep.subr.mxu1 %v202_v13  ;;  %678 = vmatpush3.msra.mxu0 %v154_v14  ;;  %v144_v54 = vld [vmem:[#allocation5 + $0x220] sm:$0xff]  ;;  %v191_v57 = vld [vmem:[#allocation5 + $0x398] sm:$0xff]  ;;  %v190_v61 = vld [vmem:[#allocation5 + $0x390] sm:$0xff] }
  0x4d   :  { %713 = vmatpush3.msra.mxu1 %v186_v15  ;;  %679 = vmatprep.subr.mxu0 %v169_v16  ;;  %v176_v55 = vld [vmem:[#allocation5 + $0x320] sm:$0xff]  ;;  %v143_v58 = vld [vmem:[#allocation5 + $0x218] sm:$0xff]  ;;  %v142_v62 = vld [vmem:[#allocation5 + $0x210] sm:$0xff] }
  0x4e   :  { %714 = vmatprep.subr.mxu1 %v201_v17  ;;  %680 = vmatpush3.msra.mxu0 %v153_v18  ;;  %v175_v59 = vld [vmem:[#allocation5 + $0x318] sm:$0xff]  ;;  %v174_v63 = vld [vmem:[#allocation5 + $0x310] sm:$0xff]  ;;  %v157_v0 = vld [vmem:[#allocation5 + $0x288] sm:$0xff]  ;;  %v896_v17 = vmov 0.0  }
  0x4f   :  { %715 = vmatpush3.msra.mxu1 %v185_v19  ;;  %681 = vmatprep.subr.mxu0 %v168_v20  ;;  %v65_v1 = vld [vmem:[#allocation2 + $0x28] sm:$0xff]  ;;  %v67_v4 = vld [vmem:[#allocation2 + $0x38] sm:$0xff]  ;;  %v64_v6 = vld [vmem:[#allocation2 + $0x20] sm:$0xff] }
  0x50   :  { %716 = vmatprep.subr.mxu1 %v200_v21  ;;  %682 = vmatpush3.msra.mxu0 %v152_v22  ;;  %v189_v2 = vld [vmem:[#allocation5 + $0x388] sm:$0xff]  ;;  %v66_v7 = vld [vmem:[#allocation2 + $0x30] sm:$0xff]  ;;  %v156_v8 = vld [vmem:[#allocation5 + $0x280] sm:$0xff]  ;;  %v73_v10 = vcvt.s32.f32 %v65_v1  ;;  %v75_v12 = vcvt.s32.f32 %v67_v4  ;;  %v72_v14 = vcvt.s32.f32 %v64_v6 }
  0x51   :  { %717 = vmatpush3.msra.mxu1 %v184_v23  ;;  %683 = vmatprep.subr.mxu0 %v167_v24  ;;  %v141_v3 = vld [vmem:[#allocation5 + $0x208] sm:$0xff]  ;;  %v188_v9 = vld [vmem:[#allocation5 + $0x380] sm:$0xff]  ;;  %v74_v15 = vcvt.s32.f32 %v66_v7  ;;  %v507_v16 = vld [vmem:[#allocation7 + $0x78] sm:$0xff] }
  0x52   :  { %718 = vmatprep.subr.mxu1 %v199_v25  ;;  %684 = vmatpush3.msra.mxu0 %v151_v26  ;;  %v173_v5 = vld [vmem:[#allocation5 + $0x308] sm:$0xff]  ;;  %v140_v11 = vld [vmem:[#allocation5 + $0x200] sm:$0xff]  ;;  %v506_v18 = vld [vmem:[#allocation7 + $0x70] sm:$0xff] }
  0x53   :  { %719 = vmatpush3.msra.mxu1 %v183_v27  ;;  %685 = vmatprep.subr.mxu0 %v166_v28  ;;  %v172_v13 = vld [vmem:[#allocation5 + $0x300] sm:$0xff]  ;;  %v505_v19 = vld [vmem:[#allocation7 + $0x68] sm:$0xff]  ;;  %v503_v21 = vld [vmem:[#allocation7 + $0x58] sm:$0xff] }
  0x54   :  { %720 = vmatprep.subr.mxu1 %v198_v29  ;;  %686 = vmatpush3.msra.mxu0 %v150_v30  ;;  %v504_v20 = vld [vmem:[#allocation7 + $0x60] sm:$0xff]  ;;  %v502_v22 = vld [vmem:[#allocation7 + $0x50] sm:$0xff]  ;;  %v501_v23 = vld [vmem:[#allocation7 + $0x48] sm:$0xff] }
  0x55   :  { %721 = vmatpush3.msra.mxu1 %v182_v31  ;;  %687 = vmatprep.subr.mxu0 %v165_v32  ;;  %v500_v24 = vld [vmem:[#allocation7 + $0x40] sm:$0xff]  ;;  %v499_v25 = vld [vmem:[#allocation7 + $0x38] sm:$0xff]  ;;  %v498_v26 = vld [vmem:[#allocation7 + $0x30] sm:$0xff] }
  0x56   :  { %722 = vmatprep.subr.mxu1 %v197_v33  ;;  %688 = vmatpush3.msra.mxu0 %v149_v34  ;;  %v497_v27 = vld [vmem:[#allocation7 + $0x28] sm:$0xff]  ;;  %v496_v28 = vld [vmem:[#allocation7 + $0x20] sm:$0xff]  ;;  %v495_v29 = vld [vmem:[#allocation7 + $0x18] sm:$0xff] }
  0x57   :  { %723 = vmatpush3.msra.mxu1 %v181_v35  ;;  %689 = vmatprep.subr.mxu0 %v164_v36  ;;  %v494_v30 = vld [vmem:[#allocation7 + $0x10] sm:$0xff]  ;;  %v493_v31 = vld [vmem:[#allocation7 + $0x8] sm:$0xff]  ;;  %v492_v32 = vld [vmem:[#allocation7] sm:$0xff] }
  0x58   :  { %724 = vmatprep.subr.mxu1 %v196_v37  ;;  %690 = vmatpush3.msra.mxu0 %v148_v38  ;;  %v603_v37 = vld [vmem:[%s950_s3] ss:$0 sm:$0xff]  ;;  %s898_s3 = smov [#allocation8]  }
  0x59   :  { %725 = vmatpush3.msra.mxu1 %v180_v39  ;;  %691 = vmatprep.subr.mxu0 %v163_v40  ;;  %s593_s11 = sshll.u32 %s898_s3, 4  ;;  %s594_s11 = int_to_ptr.vmem [resolvable:$true] %s593_s11 }
  0x5a   :  { %726 = vmatprep.subr.mxu1 %v195_v41  ;;  %692 = vmatpush3.msra.mxu0 %v147_v42  ;;  %s865_s12 = scalar_lea.vmem %s594_s11, 128  ;;  %p870_p2 = scmp.lt.s32.totalorder %s594_s11, %s594_s11 }
  0x5b   :  { %727 = vmatpush3.msra.mxu1 %v179_v43  ;;  %693 = vmatprep.subr.mxu0 %v162_v44  ;;  %p866_p1 = scmp.ne.s32.totalorder %s594_s11, %s865_s12  ;;  %p871_p3 = scmp.lt.s32.totalorder %s865_s12, %s865_s12 }
  0x5c   :  { %728 = vmatprep.subr.mxu1 %v194_v45  ;;  %694 = vmatpush3.msra.mxu0 %v146_v46 }
  0x5d   :  { %729 = vmatpush3.msra.mxu1 %v178_v47  ;;  %695 = vmatprep.subr.mxu0 %v161_v48  ;;  %p872_p4 = por %p871_p3, %p870_p2 }
  0x5e   :  { %730 = vmatprep.subr.mxu1 %v193_v49  ;;  %696 = vmatpush3.msra.mxu0 %v145_v50 }
  0x5f   :  { %731 = vmatpush3.msra.mxu1 %v177_v51  ;;  %697 = vmatprep.subr.mxu0 %v160_v52  ;;  %v604_v51 = vld [vmem:[%s951_s4] ss:$0 sm:$0xff]  ;;  %p873_p5 = pnand %p872_p4, %p866_p1 }
  0x60   :  { %732 = vmatprep.subr.mxu1 %v192_v53  ;;  %698 = vmatpush3.msra.mxu0 %v144_v54 }
  0x61   :  { %733 = vmatpush3.msra.mxu1 %v176_v55  ;;  %699 = vmatprep.subr.mxu0 %v159_v56 }
  0x62   :  { %734 = vmatprep.subr.mxu1 %v191_v57  ;;  %700 = vmatpush3.msra.mxu0 %v143_v58 }
  0x63   :  { %735 = vmatpush3.msra.mxu1 %v175_v59  ;;  %701 = vmatprep.subr.mxu0 %v158_v60 }
  0x64   :  { %736 = vmatprep.subr.mxu1 %v190_v61  ;;  %702 = vmatpush3.msra.mxu0 %v142_v62 }
  0x65   :  { %737 = vmatpush3.msra.mxu1 %v174_v63  ;;  %703 = vmatprep.subr.mxu0 %v157_v0 }
  0x66   :  { %738 = vmatprep.subr.mxu1 %v189_v2  ;;  %704 = vmatpush3.msra.mxu0 %v141_v3 }
  0x67   :  { %739 = vmatpush3.msra.mxu1 %v173_v5  ;;  %705 = vmatprep.subr.mxu0 %v156_v8 }
  0x68   :  { %740 = vmatprep.subr.mxu1 %v188_v9  ;;  %706 = vmatpush3.msra.mxu0 %v140_v11 }
  0x69   :  { %415 = vmatprep.mubr.f32.mxu0 %v73_v10  ;;  %741 = vmatpush3.msra.mxu1 %v172_v13 }
  0x6a   :  { %485 = vmatprep.mubr.f32.mxu1 %v75_v12  ;;  %416 = vmatmul.mubr.f32.vlgmr.msra.gmra.mxu0 %v72_v14 }
  0x6b   :  { %486 = vmatmul.mubr.f32.vlgmr.msra.gmra.mxu1 %v74_v15  ;;  %762 = vmatprep.subr.mxu0 %v896_v17 }
  0x6c   :  { %763 = vmatpush3.msra.mxu0 %v507_v16  ;;  %794 = vmatprep.mubr.msk.f32.mxu0 %vm897_vm0, %v896_v17 }
  0x6d   :  { %764 = vmatprep.subr.mxu0 %v896_v17 }
  0x6e   :  { %765 = vmatpush3.msra.mxu0 %v506_v18 }
  0x6f   :  { %766 = vmatprep.subr.mxu0 %v896_v17 }
  0x70   :  { %767 = vmatpush3.msra.mxu0 %v505_v19 }
  0x71   :  { %768 = vmatprep.subr.mxu0 %v896_v17 }
  0x72   :  { %769 = vmatpush3.msra.mxu0 %v504_v20 }
  0x73   :  { %770 = vmatprep.subr.mxu0 %v896_v17 }
  0x74   :  { %771 = vmatpush3.msra.mxu0 %v503_v21 }
  0x75   :  { %772 = vmatprep.subr.mxu0 %v896_v17 }
  0x76   :  { %773 = vmatpush3.msra.mxu0 %v502_v22 }
  0x77   :  { %774 = vmatprep.subr.mxu0 %v896_v17 }
  0x78   :  { %775 = vmatpush3.msra.mxu0 %v501_v23 }
  0x79   :  { %776 = vmatprep.subr.mxu0 %v896_v17 }
  0x7a   :  { %777 = vmatpush3.msra.mxu0 %v500_v24 }
  0x7b   :  { %778 = vmatprep.subr.mxu0 %v896_v17 }
  0x7c   :  { %779 = vmatpush3.msra.mxu0 %v499_v25 }
  0x7d   :  { %780 = vmatprep.subr.mxu0 %v896_v17 }
  0x7e   :  { %781 = vmatpush3.msra.mxu0 %v498_v26 }
  0x7f   :  { %782 = vmatprep.subr.mxu0 %v896_v17 }
  0x80   :  { %783 = vmatpush3.msra.mxu0 %v497_v27 }
  0x81   :  { %784 = vmatprep.subr.mxu0 %v896_v17 }
  0x82   :  { %785 = vmatpush3.msra.mxu0 %v496_v28 }
  0x83   :  { %786 = vmatprep.subr.mxu0 %v896_v17 }
  0x84   :  { %787 = vmatpush3.msra.mxu0 %v495_v29 }
  0x85   :  { %788 = vmatprep.subr.mxu0 %v896_v17 }
  0x86   :  { %789 = vmatpush3.msra.mxu0 %v494_v30 }
  0x87   :  { %790 = vmatprep.subr.mxu0 %v896_v17 }
  0x88   :  { %791 = vmatpush3.msra.mxu0 %v493_v31 }
  0x89   :  { %792 = vmatprep.subr.mxu0 %v896_v17 }
  0x8a   :  { %793 = vmatpush3.msra.mxu0 %v492_v32 }
 0x108   :  { %v637_v33 = vpop.f32.mrf.mxu0 }
 0x10a   :  { %v672_v34 = vpop.f32.mrf.mxu1  ;;  %v638_v35 = vpop.f32.mrf.mxu0 }
 0x10b   :  { %v639_v36 = vadd.f32 %v638_v35, %v637_v33 }
 0x10c   :  { %v673_v38 = vpop.f32.mrf.mxu1 }
 0x10d   :  { %v278_v39 = vadd.f32 %v639_v36, %v603_v37  ;;  %v674_v40 = vadd.f32 %v673_v38, %v672_v34 }
 0x10f   :  { %v348_v45 = vadd.f32 %v674_v40, %v278_v39 }
 0x12a   :  { %v707_v41 = vpop.f32.mrf.mxu0 }
 0x12b   :  { %v742_v42 = vpop.f32.mrf.mxu1 }
 0x12c   :  { %v708_v43 = vpop.f32.mrf.mxu0 }
 0x12d   :  { %v743_v44 = vpop.f32.mrf.mxu1  ;;  %v709_v46 = vadd.f32 %v708_v43, %v707_v41 }
 0x12e   :  { %v744_v48 = vadd.f32 %v743_v44, %v742_v42 }
 0x12f   :  { %v418_v47 = vadd.f32 %v709_v46, %v348_v45 }
 0x131   :  { %v488_v49 = vadd.f32 %v744_v48, %v418_v47 }
 0x133   :  { %v491_v50 = vmax.f32 %v488_v49, 0.0 }
 0x135   :  { %795 = vmatmul.mubr.f32.vlgmr.msra.gmra.mxu0 %v491_v50 }
 0x1f5   :  { %v581_v52 = vpop.f32.mrf.mxu0 }
 0x1f6   :  { %v582_v53 = vadd.f32 %v604_v51, %v581_v52 }
 0x1f7   :  { %v796_v54 = vpop.f32.mrf.mxu0 }
 0x1f8   :  { %v585_v55 = vmax.f32 %v582_v53, 0.0 }
 0x1fa   :  { %586 = vst [vmem:[#allocation8] sm:$0xff] %v585_v55 }
 0x1fb   :  { %876 = shalt.err (!%p873_p5)
}
 0x1fc   :  { %596 = dma.vmem_to_hbm [thread:$0]  %s594_s11, 128, %s952_s5, [#allocation4]  }
 0x1fd   :  { %889 = dma.done.wait [#allocation4], 128  }
 0x1fe   :  { %890 = vsyncadd [#allocation4], 4294967168 }
 0x1ff   :  { %600 = vsyncpa [#allocation3], 1 }
 0x200   :  { %601 = vsyncpa [#allocation6], 1 }
 0x201   :  { %602 = vsyncpa [#allocation4], 1 }

</bundles_post_ra>
